<compile_context>
chip_gen: v6e
topology: v6e:2x2x1
jax: 0.10.0
libtpu: 0.0.40
codegen_flags: <defaults>
</compile_context>

<pallas_src>
import functools

import jax
import jax.numpy as jnp
from jax.experimental import pallas as pl
from jax.experimental.pallas import tpu as pltpu


# ---------------------------------------------------------------------------
# Kernel 1: to_attn_bias — head-major bias projection.
#   grid = (B, N // TI); pairwise block (TI, N, D) -> bias block (H, TI, N)
#   bias[b, h, q, k] = sum_d pairwise[b, q, k, d] * wb[d, h]
#   Computed as wb^T @ x^T so the output's minor dim is N (lane-dense).
# ---------------------------------------------------------------------------
def _bias_kernel(p_ref, wbt_ref, o_ref):
    ti, n, d = p_ref.shape
    x2 = p_ref[...].reshape(ti * n, d).astype(jnp.bfloat16)        # (M, D)
    wbt = wbt_ref[...].astype(jnp.bfloat16)                        # (H, D)
    # (H, D) x (M, D)^T -> (H, M), f32 accumulation.
    bt = jax.lax.dot_general(wbt, x2, (((1,), (1,)), ((), ())),
                             preferred_element_type=jnp.float32)
    o_ref[...] = bt.reshape(o_ref.shape)                           # (H, TI, N)


# ---------------------------------------------------------------------------
# Kernel 2: gated multi-head attention over a block of TI row-sequences.
#   x_ref   : (TI, N, D)   — TI independent sequences of length N
#   bias_ref: (H, N, N)    — shared by every row-sequence of this batch
#   wq/wk/wv/wg_ref : (H, D, dh);  wo_ref : (H, dh, D)   (bf16)
#   o_ref   : (TI, N, D)
# ---------------------------------------------------------------------------
def _attn_kernel(x_ref, bias_ref, wq_ref, wk_ref, wv_ref, wg_ref, wo_ref, o_ref,
                 *, heads, dim_head):
    ti, n, d = x_ref.shape
    scale = dim_head ** -0.5
    x = x_ref[...].reshape(ti * n, d).astype(jnp.bfloat16)         # (M, D) bf16

    out_acc = jnp.zeros((ti * n, d), jnp.float32)
    for h in range(heads):                                         # static unroll (H small)
        wq = wq_ref[h].astype(jnp.bfloat16)                        # (D, dh)
        wk = wk_ref[h].astype(jnp.bfloat16)
        wv = wv_ref[h].astype(jnp.bfloat16)
        wg = wg_ref[h].astype(jnp.bfloat16)
        wo = wo_ref[h].astype(jnp.bfloat16)                        # (dh, D)

        q = jnp.dot(x, wq, preferred_element_type=jnp.float32)     # (M, dh) f32
        k = jnp.dot(x, wk, preferred_element_type=jnp.float32)
        v = jnp.dot(x, wv, preferred_element_type=jnp.float32)
        g = jax.nn.sigmoid(jnp.dot(x, wg, preferred_element_type=jnp.float32))

        q3 = q.reshape(ti, n, dim_head).astype(jnp.bfloat16)
        k3 = k.reshape(ti, n, dim_head).astype(jnp.bfloat16)
        v3 = v.reshape(ti, n, dim_head).astype(jnp.bfloat16)

        # Batched QK^T over the TI independent sequences.
        sim = jnp.einsum("tqe,tke->tqk", q3, k3,
                         preferred_element_type=jnp.float32)       # (TI, N, N)
        sim = sim * scale + bias_ref[h]                            # (N, N) bias broadcasts over TI
        sim = sim - jnp.max(sim, axis=-1, keepdims=True)
        p = jnp.exp(sim)
        inv = pl.reciprocal(jnp.sum(p, axis=-1, keepdims=True), approx=True)
        attn = (p * inv).astype(jnp.bfloat16)

        o_h = jnp.einsum("tqk,tke->tqe", attn, v3,
                         preferred_element_type=jnp.float32)       # (TI, N, dh)
        o_h = o_h * g.reshape(ti, n, dim_head)                     # per-head gate (pre-Wo)
        out_acc = out_acc + jnp.dot(
            o_h.reshape(ti * n, dim_head).astype(jnp.bfloat16), wo,
            preferred_element_type=jnp.float32)                    # accumulate Wo projection
    o_ref[...] = out_acc.reshape(ti, n, d).astype(o_ref.dtype)


# ---------------------------------------------------------------------------
# Wrapper
# ---------------------------------------------------------------------------
def triangle_attention(pairwise, params, *, heads, dim_head, node_type="starting",
                       mask=None, block_rows=None):
    # TODO(synk): key-padding mask path not implemented (mask must be None).
    assert mask is None
    need_transpose = node_type == "ending"
    if need_transpose:
        pairwise = jnp.swapaxes(pairwise, 1, 2)          # 'b i j d -> b j i d'

    B, N, N2, D = pairwise.shape
    assert N == N2
    H, dh = heads, dim_head
    DI = H * dh
    assert params["wq"].shape == (D, DI) and params["wo"].shape == (DI, D)

    # Rows per grid step.  Must be a multiple of 8 (sublane tiling of the
    # head-major bias output block) or equal to N.  Raise for large N to keep
    # the MXU fed, subject to VMEM.
    if block_rows is None:
        block_rows = 8 if (N % 8 == 0 and N > 8) else N
    TI = block_rows
    assert N % TI == 0 and (TI % 8 == 0 or TI == N)
    n_blocks = N // TI

    # Host-side weight re-layout (outside the kernels, essentially free):
    # per-head layouts so the kernel indexes heads on the leading dim, and
    # everything the MXU touches is bf16 (halves weight DMA + VMEM).
    wbt = params["wb"].T.astype(jnp.bfloat16)                              # (H, D)

    def per_head_in(w):      # (D, H*dh) -> (H, D, dh)
        return jnp.transpose(w.reshape(D, H, dh), (1, 0, 2)).astype(jnp.bfloat16)

    wq_h = per_head_in(params["wq"])
    wk_h = per_head_in(params["wk"])
    wv_h = per_head_in(params["wv"])
    wg_h = per_head_in(params["wg"])
    wo_h = params["wo"].reshape(H, dh, D).astype(jnp.bfloat16)             # (H, dh, D)

    # --- Kernel 1: attn_bias in head-major (B, H, N, N), row-blocked ---
    attn_bias = pl.pallas_call(
        _bias_kernel,
        out_shape=jax.ShapeDtypeStruct((B, H, N, N), jnp.float32),
        grid=(B, n_blocks),
        in_specs=[
            pl.BlockSpec((None, TI, N, D), lambda b, i: (b, i, 0, 0)),
            pl.BlockSpec((H, D), lambda b, i: (0, 0)),
        ],
        out_specs=pl.BlockSpec((None, H, TI, N), lambda b, i: (b, 0, i, 0)),
        compiler_params=pltpu.CompilerParams(
            dimension_semantics=("parallel", "parallel")),
    )(pairwise, wbt)

    # --- Kernel 2: gated attention, TI row-sequences per grid step ---
    kernel = functools.partial(_attn_kernel, heads=H, dim_head=dh)
    w_in = pl.BlockSpec((H, D, dh), lambda b, i: (0, 0, 0))
    out = pl.pallas_call(
        kernel,
        out_shape=jax.ShapeDtypeStruct((B, N, N, D), pairwise.dtype),
        grid=(B, n_blocks),
        in_specs=[
            pl.BlockSpec((None, TI, N, D), lambda b, i: (b, i, 0, 0)),   # TI rows of batch b
            pl.BlockSpec((None, H, N, N), lambda b, i: (b, 0, 0, 0)),    # bias, resident per b
            w_in, w_in, w_in, w_in,                                      # wq, wk, wv, wg
            pl.BlockSpec((H, dh, D), lambda b, i: (0, 0, 0)),            # wo
        ],
        out_specs=pl.BlockSpec((None, TI, N, D), lambda b, i: (b, i, 0, 0)),
        compiler_params=pltpu.CompilerParams(
            dimension_semantics=("parallel", "parallel")),
    )(pairwise, attn_bias, wq_h, wk_h, wv_h, wg_h, wo_h)

    if need_transpose:
        out = jnp.swapaxes(out, 1, 2)                    # 'b j i d -> b i j d'
    # Dropout(prob=0.0) -> identity.
    return out


# ---------------------------------------------------------------------------
# Pure-JAX reference (mirrors the PyTorch forward; f32 math via per-op
# precision=HIGHEST, no global config mutation)
# ---------------------------------------------------------------------------
def triangle_attention_ref(pairwise, params, *, heads, dim_head, node_type="starting"):
    hi = jax.lax.Precision.HIGHEST
    need_transpose = node_type == "ending"
    if need_transpose:
        pairwise = jnp.swapaxes(pairwise, 1, 2)
    B, N, _, D = pairwise.shape
    bias = jnp.einsum("bijd,dh->bhij", pairwise, params["wb"], precision=hi)
    bias = jnp.repeat(bias, N, axis=0)                           # (B*N, H, N, N)
    x = pairwise.reshape(B * N, N, D)

    def proj(w):
        return jnp.einsum("bnd,de->bne", x, w, precision=hi)

    q = proj(params["wq"]).reshape(B * N, N, heads, dim_head)
    k = proj(params["wk"]).reshape(B * N, N, heads, dim_head)
    v = proj(params["wv"]).reshape(B * N, N, heads, dim_head)
    g = jax.nn.sigmoid(proj(params["wg"])).reshape(B * N, N, heads, dim_head)
    sim = jnp.einsum("bqhe,bkhe->bhqk", q, k, precision=hi) * dim_head ** -0.5 + bias
    attn = jax.nn.softmax(sim, axis=-1)
    o = jnp.einsum("bhqk,bkhe->bqhe", attn, v, precision=hi) * g
    o = jnp.einsum("bne,ed->bnd", o.reshape(B * N, N, heads * dim_head),
                   params["wo"], precision=hi)
    o = o.reshape(B, N, N, D)
    if need_transpose:
        o = jnp.swapaxes(o, 1, 2)
    return o


if __name__ == "__main__":
    B, N, D = 2, 16, 32
    HEADS, DIM_HEAD = 4, 8
    DI = HEADS * DIM_HEAD

    key = jax.random.PRNGKey(0)
    ks = jax.random.split(key, 7)

    def init(k, shape, fan_in):
        return jax.random.normal(k, shape, jnp.float32) / jnp.sqrt(fan_in)

    params = {
        "wb": init(ks[0], (D, HEADS), D),     # to_attn_bias (LinearNoBias dim->heads)
        "wq": init(ks[1], (D, DI), D),
        "wk": init(ks[2], (D, DI), D),
        "wv": init(ks[3], (D, DI), D),
        "wg": init(ks[4], (D, DI), D),
        "wo": init(ks[5], (DI, D), DI),
    }
    pairwise = jax.random.normal(ks[6], (B, N, N, D), jnp.float32)

    ok = True
    for node_type in ("starting", "ending"):
        out = triangle_attention(pairwise, params, heads=HEADS, dim_head=DIM_HEAD,
                                 node_type=node_type)
        out = jax.block_until_ready(out)
        ref = triangle_attention_ref(pairwise, params, heads=HEADS,
                                     dim_head=DIM_HEAD, node_type=node_type)
        err = float(jnp.max(jnp.abs(out - ref)))
        # bf16 MXU operands (f32 accumulation) vs a pure-f32 reference:
        # allow bf16-level error on O(1)-magnitude outputs.
        if err > 1e-1:
            ok = False
            print(f"MISMATCH ({node_type}): max abs err = {err}")

    if ok:
        print("KERNEL_OK")
</pallas_src>

<mosaic_0001>
module attributes {stable_mosaic.version = 11 : i64} {
  func.func @_bias_kernel(%arg0: i32, %arg1: i32, %arg2: memref<1x8x16x32xf32, #tpu.memory_space<vmem>>, %arg3: memref<4x32xbf16, #tpu.memory_space<vmem>>, %arg4: memref<1x4x8x16xf32, #tpu.memory_space<vmem>>) attributes {dimension_semantics = [#tpu.dimension_semantics<parallel>, #tpu.dimension_semantics<parallel>], iteration_bounds = array<i64: 2, 2>, scalar_prefetch = 0 : i64, scratch_operands = 0 : i64, tpu.core_type = #tpu.core_type<tc>, window_params = [{transform_indices = @transform_0, window_bounds = array<i64: 1, 8, 16, 32>}, {pipeline_mode = #tpu.pipeline_mode<synchronous>, transform_indices = @transform_1, window_bounds = array<i64: 4, 32>}, {transform_indices = @transform_2, window_bounds = array<i64: 1, 4, 8, 16>}]} {
    %c0 = arith.constant 0 : index
    %c0_0 = arith.constant 0 : index
    %c0_1 = arith.constant 0 : index
    %c0_2 = arith.constant 0 : index
    %0 = vector.load %arg2[%c0, %c0_0, %c0_1, %c0_2] : memref<1x8x16x32xf32, #tpu.memory_space<vmem>>, vector<1x8x16x32xf32>
    %1 = vector.shape_cast %0 : vector<1x8x16x32xf32> to vector<8x16x32xf32>
    %2 = vector.shape_cast %1 : vector<8x16x32xf32> to vector<128x32xf32>
    %3 = arith.truncf %2 : vector<128x32xf32> to vector<128x32xbf16>
    %c0_3 = arith.constant 0 : index
    %c0_4 = arith.constant 0 : index
    %4 = vector.load %arg3[%c0_3, %c0_4] : memref<4x32xbf16, #tpu.memory_space<vmem>>, vector<4x32xbf16>
    %cst = arith.constant dense<0.000000e+00> : vector<4x128xf32>
    %5 = tpu.matmul %4, %3, %cst {dimension_numbers = #tpu.dot_dimension_numbers<[1], [1], [0], [0], [0, 0, 1, 0], [], []>} : vector<4x32xbf16>, vector<128x32xbf16>, vector<4x128xf32> -> vector<4x128xf32>
    %6 = vector.shape_cast %5 : vector<4x128xf32> to vector<4x8x16xf32>
    %c0_5 = arith.constant 0 : index
    %c0_6 = arith.constant 0 : index
    %c0_7 = arith.constant 0 : index
    %c0_8 = arith.constant 0 : index
    %7 = vector.load %arg4[%c0_5, %c0_6, %c0_7, %c0_8] : memref<1x4x8x16xf32, #tpu.memory_space<vmem>>, vector<1x4x8x16xf32>
    %8 = vector.shape_cast %7 : vector<1x4x8x16xf32> to vector<4x8x16xf32>
    %9 = vector.shape_cast %6 : vector<4x8x16xf32> to vector<1x4x8x16xf32>
    tpu.vector_store %arg4[%c0_5, %c0_6, %c0_7, %c0_8], %9 {strides = array<i32>} : memref<1x4x8x16xf32, #tpu.memory_space<vmem>>, vector<1x4x8x16xf32>,
    return
  }
  func.func @transform_0(%arg0: i32, %arg1: i32) -> (i32, i32, i32, i32) {
    %c0_i32 = arith.constant 0 : i32
    %c0_i32_0 = arith.constant 0 : i32
    %c0_i32_1 = arith.constant 0 : i32
    return %arg0, %arg1, %c0_i32, %c0_i32_0 : i32, i32, i32, i32
  }
  func.func @transform_1(%arg0: i32, %arg1: i32) -> (i32, i32) {
    %c0_i32 = arith.constant 0 : i32
    %c0_i32_0 = arith.constant 0 : i32
    %c0_i32_1 = arith.constant 0 : i32
    return %c0_i32, %c0_i32_0 : i32, i32
  }
  func.func @transform_2(%arg0: i32, %arg1: i32) -> (i32, i32, i32, i32) {
    %c0_i32 = arith.constant 0 : i32
    %c0_i32_0 = arith.constant 0 : i32
    %c0_i32_1 = arith.constant 0 : i32
    return %arg0, %c0_i32, %arg1, %c0_i32_0 : i32, i32, i32, i32
  }
}

</mosaic_0001>

<bundles_post_ra>
// kernel: tpu_custom_call.1
= control target key start
LH: loop header
LB: loop body
LE: loop exit
PB: predicated region body
PF: predicated region fallthrough
CT: control target
= control target key end

     0   :  { %s1062_s0 = inlined_call_operand.hbm [shape: f32[2,16,16,32], index: 0, kind: input, shape index: {}]   ;;  %s1063_s1 = inlined_call_operand.hbm [shape: bf16[4,32], index: 1, kind: input, shape index: {}]   ;;  %s1064_s2 = inlined_call_operand.hbm [shape: f32[2,4,16,16], index: 2, kind: output, shape index: {}]  }
   0x1   :  { %1074 = sst [smem:[#allocation16_spill]] %s1063_s1 }
   0x2   :  { %7 = vsyncpa [#allocation3], 0 }
   0x3   :  { %9 = vsyncpa [#allocation3 + $0x1], 0 }
   0x4   :  { %10 = vsyncpa [#allocation6], 0 }
   0x5   :  { %11 = vsyncpa [#allocation4], 0 }
   0x6   :  { %13 = vsyncpa [#allocation4 + $0x1], 0  ;;  %s843_s9 = smov 0   ;;  %s845_s10 = smov 0  }
   0x7   :  { %s847_s11 = smov 0   ;;  %s849_s12 = smov 0  }
   0x8   :  { %s851_s13 = smov 0   ;;  %s853_s14 = smov 0  }
   0x9   :  { %s855_s15 = smov 0   ;;  %s857_s16 = smov 0  }
   0xa LB: > { %1075 = sst [smem:[#allocation11_spill]] %s779_s9  ;;  %s498_s17 = sadd.s32 4294967295, %s807_s16   ;;  %s807_s16 = sphi %s857_s16, %s19_s16   ;;  %s803_s15 = sphi %s855_s15, %s1103_s15   ;;  %s799_s14 = sphi %s853_s14, %s1102_s14   ;;  %s795_s13 = sphi %s851_s13, %s1101_s13   ;;  %s791_s12 = sphi %s849_s12, %s1096_s12   ;;  %s787_s11 = sphi %s847_s11, %s1100_s11   ;;  %s783_s10 = sphi %s845_s10, %s1099_s10   ;;  %s779_s9 = sphi %s843_s9, %s1098_s9  }
   0xb   : > { %1076 = sst [smem:[#allocation12_spill]] %s799_s14  ;;  %s499_s18 = sadd.s32 4294967294, %s807_s16  }
   0xc   : > { %1077 = sst [smem:[#allocation13_spill]] %s807_s16  ;;  %p47_p0 = scmp.ne.s32.totalorder %s787_s11, %s783_s10 }
   0xd   : > { %p48_p1 = scmp.eq.s32.totalorder %s807_s16, 0  ;;  %p53_p2 = scmp.ne.s32.totalorder %s783_s10, %s779_s9 }
   0xe   : > { %p891_p3 = scmp.eq.s32.totalorder %s498_s17, 0  ;;  %p100_p4 = scmp.eq.s32.totalorder %s498_s17, 3 }
   0xf   : > { %p895_p5 = por %p48_p1, %p47_p0  ;;  %p106_p6 = scmp.eq.s32.totalorder %s499_s18, 3 }
  0x10   : > { %p901_p7 = por %p891_p3, %p53_p2  ;;  %p905_p8 = por %p100_p4, %p47_p0 }
  0x11   : > { %p909_p9 = por %p106_p6, %p53_p2  ;;  %p500_p10 = scmp.ge.s32.totalorder %s807_s16, 1 }
  0x12   : > { %s1080_s22 = scalar_select %p901_p7, 1, 0 }
  0x13   : > { %s1081_s23 = scalar_select %p905_p8, 1, 0 }
  0x14   : > { %s1082_s24 = scalar_select %p909_p9, 1, 0 }
  0x15   : > { %p113_p11 = scmp.lt.s32.totalorder %s807_s16, 5  ;;  %s809_s26 = smov [#allocation5]  }
  0x16   : > { %1083 = sst [smem:[#allocation14_spill]] %s1082_s24  ;;  %s126_s27 = sshll.u32 %s809_s26, 4  ;;  %s127_s27 = int_to_ptr.vmem [resolvable:$true] %s126_s27 }
  0x17   : > { %p915_p12 = pnand %p500_p10, %p113_p11  ;;  %p569_p13 = scmp.lt.s32.totalorder %s807_s16, 4 }
  0x18   : > { %s28_s29 = sadd.s32 1, %s799_s14  ;;  %s664_s30 = scalar_lea.vmem %s127_s27, 32 }
  0x19   : > { %s1084_s25 = scalar_select %p915_p12, 1, 0 }
  0x1a   : > { %p556_p0 = pneg %p915_p12  ;;  %p924_p1 = pnand %p569_p13, %p895_p5 }
  0x1b   : > { %p665_p6 = scmp.ne.s32.totalorder %s127_s27, %s664_s30  ;;  %p672_p9 = scmp.lt.s32.totalorder %s127_s27, %s127_s27 }
  0x1c   : > { %p557_p2 = pnand %p556_p0, %p891_p3  ;;  %p673_p8 = scmp.lt.s32.totalorder %s664_s30, %s664_s30 }
  0x1e   : > { %p655_p4 = pneg %p557_p2  ;;  %p674_p7 = por %p673_p8, %p672_p9 }
  0x20   : > { %p667_p10 = pnand %p665_p6, %p655_p4 }
  0x22   : > { %p668_p11 = pneg %p667_p10 }
  0x24   : > { %p675_p12 = pnand %p674_p7, %p668_p11 }
  0x26   : > { %678 = shalt.err (!%p675_p12)
}
  0x27   : > { %s1086_s1 = sld [smem:[#allocation16_spill]]  ;;  %p29_p5 = scmp.ge.s32.totalorder %s28_s29, 2 }
  0x28   : > { %s31_s5 = sadd.s32 1, %s803_s15  ;;  %s137_s6 = sand.u32 1, %s787_s11  }
  0x29   : > { %s518_s7 = sshll.u32 %s799_s14, 4  ;;  %s1105_s29 = smov (%p29_p5, %s28_s29), 0 }
  0x2a   : > { %1087 = sst [smem:[#allocation15_spill]] %s1105_s29  ;;  %s1107_s5 = smov (!%p29_p5, %s31_s5), %s803_s15 }
  0x2b   : > { %s36_s8 = ssub.s32 %s799_s14, %s1105_s29  ;;  %p33_p7 = scmp.ge.s32.totalorder %s1107_s5, 2 }
  0x2c   : > { %s503_s17 = sshll.u32 %s137_s6, 7  ;;  %s506_s18 = sshll.u32 %s803_s15, 5 }
  0x2d   : > { %559 = dma.hbm_to_vmem [thread:$0]  (!%p557_p2), %s1086_s1, 32, %s127_s27, [#allocation6]  }
  0x2e   : > { %s1109_s5 = smov (%p33_p7, %s1107_s5), 0  ;;  %s148_s21 = sadd.s32 %s518_s7, %s506_s18 }
  0x2f   : > { %s141_s26 = scalar_lea.vmem [#allocation2], %s503_s17  ;;  %s35_s30 = ssub.s32 %s803_s15, %s1109_s5 }
  0x30   : > { %s151_s27 = sshll.u32 %s141_s26, 4  ;;  %s507_s3 = sshll.u32 %s148_s21, 7  ;;  %s152_s27 = int_to_ptr.vmem [resolvable:$true] %s151_s27 }
  0x31   : > { %s37_s4 = sor.u32 %s36_s8, %s35_s30  ;;  %s150_s24 = scalar_lea.hbm %s1062_s0, %s507_s3 }
  0x32   : > { %p38_p8 = scmp.eq.s32.totalorder %s37_s4, 0  ;;  %s1088_s29 = sadd.s32 1, %s787_s11 }
  0x33   : > { %s138_s9 = scalar_lea.sflag [#allocation3], %s137_s6  ;;  %p681_p9 = pneg %p924_p1 }
  0x34   : > { %s953_s14 = scalar_select %p38_p8, %s787_s11, %s1088_s29  }
  0x35   : > { %s692_s16 = scalar_lea.vmem %s152_s27, 2048  ;;  %s810_s7 = smov [#allocation2]  }
  0x36   : > { %p693_p12 = scmp.ne.s32.totalorder %s152_s27, %s692_s16  ;;  %s697_s17 = sshll.u32 %s810_s7, 4  ;;  %s698_s17 = int_to_ptr.vmem [resolvable:$false] %s697_s17 }
  0x37   : > { %s699_s8 = scalar_lea.vmem %s698_s17, 4096  ;;  %p700_p2 = scmp.lt.s32.totalorder %s152_s27, %s698_s17 }
  0x38   : > { %p695_p13 = pnand %p693_p12, %p681_p9  ;;  %p701_p4 = scmp.lt.s32.totalorder %s699_s8, %s692_s16 }
  0x3a   : > { %p696_p0 = pneg %p695_p13  ;;  %p702_p6 = por %p701_p4, %p700_p2 }
  0x3c   : > { %p703_p10 = pnand %p702_p6, %p696_p0 }
  0x3e   : > { %706 = shalt.err (!%p703_p10)
}
  0x3f   : > { %s811_s1 = smov 128   ;;  %s812_s19 = smov 8  }
  0x40   : > { %563 = dma.hbm_to_vmem [thread:$0]  (!%p924_p1), %s150_s24, 2048, %s152_s27, %s138_s9, %s811_s1, %s811_s1, %s812_s19  }
  0x41   : > { %p1089_p11 = scmp.ne.s32.totalorder %s1084_s25, 0 }
  0x42   : > { %s962_s29 = sand.u32 (!%p1089_p11), 1, %s783_s10   ;;  %p1090_p5 = scmp.ne.s32.totalorder (!%p1089_p11), %s1080_s22, 0 }
  0x43   : > { %163 = sbr.rel (%p1089_p11) target bundleno = 488 (0x1e8), region = 28  ;;  %s509_s6 = sshll.u32 (!%p1089_p11), %s962_s29, 7 }
  0x44   : > { %s166_s18 = scalar_lea.sflag (!%p1089_p11), [#allocation3], %s962_s29  ;;  %s966_s16 = scalar_lea.vmem (!%p1089_p11), [#allocation2], %s509_s6 }
  0x48   : > { %766 = dma.done.wait (%p1090_p5), %s166_s18, 2048  }
  0x49   : > { %768 = vsyncadd (%p1090_p5), %s166_s18, 4294965248 }
  0x4a   : > { %770 = dma.done.wait (%p891_p3), [#allocation6], 32  }
  0x4b   : > { %772 = vsyncadd (%p891_p3), [#allocation6], 4294967264  ;;  %v813_v0 = vmov 0.0   ;;  %vm814_vm0 = vmmov 0   ;;  %v210_v1 = vld [vmem:[%s966_s16 + $0x70] sm:$0xff]  ;;  %v211_v2 = vld [vmem:[%s966_s16 + $0x78] sm:$0xff]  ;;  %v315_v42 = vlaneseq }
  0x4c   : > { %528 = vmatprep.subr.bf16.mxu0 %v813_v0  ;;  %544 = vmatprep.mubr.msk.bf16.mxu0 %vm814_vm0, %v813_v0  ;;  %vm221_vm1 = vcmask 261120   ;;  %v219_v3 = vpack.c.bf16 %v211_v2, %v210_v1  ;;  %v208_v4 = vld [vmem:[%s966_s16 + $0x60] sm:$0xff]  ;;  %v209_v5 = vld [vmem:[%s966_s16 + $0x68] sm:$0xff]  ;;  %v206_v9 = vld [vmem:[%s966_s16 + $0x50] sm:$0xff]  ;;  %s815_s9 = smov 80   ;;  %s816_s20 = smov 112  }
  0x4d   : > { %v218_v7 = vpack.c.bf16 %v209_v5, %v208_v4  ;;  %v207_v10 = vld [vmem:[%s966_s16 + $0x58] sm:$0xff]  ;;  %v204_v13 = vld [vmem:[%s966_s16 + $0x40] sm:$0xff]  ;;  %v205_v14 = vld [vmem:[%s966_s16 + $0x48] sm:$0xff]  ;;  %s817_s22 = smov 64   ;;  %s818_s24 = smov 96   ;;  %v316_v46 = vshrl.u32 %v315_v42, 7 }
  0x4e   : > { %v247_v6 = vsel %vm221_vm1, %v219_v3, 0  ;;  %v217_v11 = vpack.c.bf16 %v207_v10, %v206_v9  ;;  %v216_v15 = vpack.c.bf16 %v205_v14, %v204_v13  ;;  %v202_v17 = vld [vmem:[%s966_s16 + $0x30] sm:$0xff]  ;;  %v203_v18 = vld [vmem:[%s966_s16 + $0x38] sm:$0xff]  ;;  %v200_v21 = vld [vmem:[%s966_s16 + $0x20] sm:$0xff]  ;;  %s819_s25 = smov 32   ;;  %s820_s28 = smov 48  }
  0x4f   : > { %529 = vmatpush3.bf16.xpose.msra.mxu0 %v247_v6  ;;  %v244_v8 = vsel %vm221_vm1, %v218_v7, 0  ;;  %v215_v19 = vpack.c.bf16 %v203_v18, %v202_v17  ;;  %v201_v22 = vld [vmem:[%s966_s16 + $0x28] sm:$0xff]  ;;  %v198_v25 = vld [vmem:[%s966_s16 + $0x10] sm:$0xff]  ;;  %v199_v26 = vld [vmem:[%s966_s16 + $0x18] sm:$0xff]  ;;  %s821_s21 = smov 16   ;;  %s511_s26 = sshll.u32 %s962_s29, 5 }
  0x50   : > { %530 = vmatprep.subr.bf16.mxu0 %v813_v0  ;;  %v241_v12 = vsel %vm221_vm1, %v217_v11, 0  ;;  %v238_v16 = vsel %vm221_vm1, %v216_v15, 0  ;;  %v214_v23 = vpack.c.bf16 %v201_v22, %v200_v21  ;;  %v213_v27 = vpack.c.bf16 %v199_v26, %v198_v25  ;;  %v196_v29 = vld [vmem:[%s966_s16] sm:$0xff]  ;;  %v197_v30 = vld [vmem:[%s966_s16 + $0x8] sm:$0xff]  ;;  %s514_s27 = sshll.u32 %s795_s13, 3  ;;  %s193_s3 = scalar_lea.vmem [#allocation7], %s511_s26 }
  0x51   : > { %v235_v20 = vsel %vm221_vm1, %v215_v19, 0  ;;  %v212_v31 = vpack.c.bf16 %v197_v30, %v196_v29  ;;  %v220_v33 = vld [vmem:[#allocation5] sm:$0x3]  ;;  %v822_v40 = vmov 1983009808   ;;  %s396_s30 = sadd.s32 %s791_s12, %s514_s27  ;;  %s399_s4 = sshll.u32 %s193_s3, 4  ;;  %s1004_s4 = int_to_ptr.vmem [resolvable:$true] %s399_s4 }
  0x52   : > { %v232_v24 = vsel %vm221_vm1, %v214_v23, 0  ;;  %v229_v28 = vsel %vm221_vm1, %v213_v27, 0  ;;  %v313_v41 = vunpack.c.l.s4 %v822_v40  ;;  %v823_v47 = vmov 1934713408   ;;  %s515_s7 = sshll.u32 %s396_s30, 7  ;;  %s385_s8 = scalar_lea.sflag [#allocation4], %s962_s29 }
  0x53   : > { %v226_v32 = vsel %vm221_vm1, %v212_v31, 0  ;;  %v346_v48 = vunpack.c.l.s4 %v823_v47  ;;  %vm379_vm2 = vcmask 130048   ;;  %s1009_s17 = scalar_lea.hbm %s1064_s2, %s515_s7  ;;  %s707_s1 = scalar_lea.vmem %s1004_s4, 512 }
  0x54   : > { %v314_v45 = vunpack.c.0.s8 %v313_v41  ;;  %p708_p3 = scmp.ne.s32.totalorder %s1004_s4, %s707_s1  ;;  %p1091_p1 = scmp.ne.s32.totalorder %s1081_s23, 0 }
  0x55   : > { %v347_v54 = vunpack.c.0.s8 %v346_v48  ;;  %s824_s19 = smov [#allocation7]  }
  0x56   : > { %v317_v52 = vsub.s32 %v314_v45, %v316_v46  ;;  %p709_p7 = pnand %p708_p3, %p1091_p1  ;;  %s711_s6 = sshll.u32 %s824_s19, 4  ;;  %s712_s6 = int_to_ptr.vmem [resolvable:$false] %s711_s6 }
  0x57   : > { %531 = vmatpush3.bf16.xpose.msra.mxu0 %v244_v8  ;;  %v350_v60 = vsub.s32 %v347_v54, %v316_v46  ;;  %s713_s18 = scalar_lea.vmem %s712_s6, 1024  ;;  %p714_p9 = scmp.lt.s32.totalorder %s1004_s4, %s712_s6 }
  0x58   : > { %532 = vmatprep.subr.bf16.mxu0 %v813_v0  ;;  %p710_p8 = pneg %p709_p7  ;;  %p715_p12 = scmp.lt.s32.totalorder %s713_s18, %s707_s1 }
  0x5a   : > { %p716_p13 = por %p715_p12, %p714_p9 }
  0x5c   : > { %p717_p0 = pnand %p716_p13, %p710_p8 }
  0x5f   : > { %533 = vmatpush3.bf16.xpose.msra.mxu0 %v241_v12 }
  0x60   : > { %534 = vmatprep.subr.bf16.mxu0 %v813_v0 }
  0x67   : > { %535 = vmatpush3.bf16.xpose.msra.mxu0 %v238_v16 }
  0x68   : > { %536 = vmatprep.subr.bf16.mxu0 %v813_v0 }
  0x6f   : > { %537 = vmatpush3.bf16.xpose.msra.mxu0 %v235_v20 }
  0x70   : > { %538 = vmatprep.subr.bf16.mxu0 %v813_v0 }
  0x77   : > { %539 = vmatpush3.bf16.xpose.msra.mxu0 %v232_v24 }
  0x78   : > { %540 = vmatprep.subr.bf16.mxu0 %v813_v0 }
  0x7f   : > { %541 = vmatpush3.bf16.xpose.msra.mxu0 %v229_v28 }
  0x80   : > { %542 = vmatprep.subr.bf16.mxu0 %v813_v0 }
  0x87   : > { %543 = vmatpush3.bf16.xpose.msra.mxu0 %v226_v32 }
  0x8e   : > { %545 = vmatmul.mubr.msk.bf16.vlgmr.msra.gmra.mxu0 %vm221_vm1, %v220_v33 }
 0x14e   : > { %v283_v34 = vpop.f32.mrf.mxu0 }
 0x14f   : > { %296 = vrot.lane.b32.xlu1 %v283_v34, %s815_s9  ;;  %290 = vrot.lane.b32.xlu0 %v283_v34, %s816_s20 }
 0x150   : > { %v546_v35 = vpop.f32.mrf.mxu0 }
 0x152   : > { %v286_v36 = vpop.f32.mrf.mxu0 }
 0x153   : > { %299 = vrot.lane.b32.xlu1 %v283_v34, %s817_s22  ;;  %293 = vrot.lane.b32.xlu0 %v283_v34, %s818_s24 }
 0x154   : > { %v547_v37 = vpop.f32.mrf.mxu0 }
 0x157   : > { %305 = vrot.lane.b32.xlu1 %v283_v34, %s819_s25  ;;  %302 = vrot.lane.b32.xlu0 %v283_v34, %s820_s28 }
 0x15b   : > { %308 = vrot.lane.b32.xlu0 %v283_v34, %s821_s21 }
 0x1c1   : > { %v297_v38 = vpop.permute.xlu1 %296  ;;  %v291_v39 = vpop.permute.xlu0 %290 }
 0x1c2   : > { %v319_v53 = vcombine.low %v291_v39, %v297_v38 }
 0x1c4   : > { %v326_v58 = vrot.slane %v319_v53, %v317_v52 }
 0x1c5   : > { %v300_v43 = vpop.permute.xlu1 %299  ;;  %v294_v44 = vpop.permute.xlu0 %293 }
 0x1c6   : > { %v311_v49 = vcombine.low %v283_v34, %v294_v44 }
 0x1c8   : > { %v318_v55 = vrot.slane %v311_v49, %v317_v52 }
 0x1c9   : > { %v306_v50 = vpop.permute.xlu1 %305  ;;  %v303_v51 = vpop.permute.xlu0 %302 }
 0x1ca   : > { %v327_v56 = vcombine.low %v300_v43, %v306_v50  ;;  %v343_v61 = vcombine.low %v318_v55, %v326_v58  ;;  %v344_v62 = vcombine.high %v318_v55, %v326_v58 }
 0x1cc   : > { %v334_v63 = vrot.slane %v327_v56, %v317_v52  ;;  %v351_v3 = vrot.slane %v343_v61, %v350_v60  ;;  %v358_v4 = vrot.slane %v344_v62, %v350_v60 }
 0x1cd   : > { %v309_v57 = vpop.permute.xlu0 %308 }
 0x1ce   : > { %v335_v59 = vcombine.low %v303_v51, %v309_v57 }
 0x1d0   : > { %v342_v0 = vrot.slane %v335_v59, %v317_v52 }
 0x1d2   : > { %v359_v1 = vcombine.low %v334_v63, %v342_v0  ;;  %v360_v2 = vcombine.high %v334_v63, %v342_v0 }
 0x1d4   : > { %v367_v5 = vrot.slane %v359_v1, %v350_v60  ;;  %v374_v6 = vrot.slane %v360_v2, %v350_v60 }
 0x1d6   : > { %v375_v7 = vcombine.low %v351_v3, %v367_v5  ;;  %v376_v8 = vcombine.high %v351_v3, %v367_v5  ;;  %v377_v9 = vcombine.low %v358_v4, %v374_v6  ;;  %v378_v10 = vcombine.high %v358_v4, %v374_v6 }
 0x1d8   : > { %380 = vst.msk [vmem:[%s193_s3] sm:$0xff] %vm379_vm2, %v375_v7  ;;  %381 = vst.msk [vmem:[%s193_s3 + $0x8] sm:$0xff] %vm379_vm2, %v376_v8 }
 0x1d9   : > { %382 = vst.msk [vmem:[%s193_s3 + $0x10] sm:$0xff] %vm379_vm2, %v377_v9  ;;  %383 = vst.msk [vmem:[%s193_s3 + $0x18] sm:$0xff] %vm379_vm2, %v378_v10 }
 0x1da   : > { %720 = shalt.err (!%p717_p0)
}
 0x1db   : > { %s721_s16 = scalar_lea.hbm %s1009_s17, 512  ;;  %s725_s22 = scalar_lea.hbm %s1064_s2, 2048 }
 0x1dc   : > { %p722_p2 = scmp.ne.s32.totalorder %s1009_s17, %s721_s16  ;;  %p726_p10 = scmp.lt.s32.totalorder %s1009_s17, %s1064_s2 }
 0x1dd   : > { %p727_p11 = scmp.lt.s32.totalorder %s725_s22, %s721_s16 }
 0x1de   : > { %p723_p4 = pnand %p722_p2, %p1091_p1 }
 0x1df   : > { %p728_p5 = por %p727_p11, %p726_p10 }
 0x1e0   : > { %p724_p6 = pneg %p723_p4 }
 0x1e2   : > { %p729_p3 = pnand %p728_p5, %p724_p6 }
 0x1e4   : > { %732 = shalt.err (!%p729_p3)
}
 0x1e5   : > { %s825_s28 = smov 128   ;;  %s826_s21 = smov 256  }
 0x1e6   : > { %s827_s26 = smov 8  }
 0x1e7   : > { %554 = dma.vmem_to_hbm [thread:$0]  (%p1091_p1), %s1004_s4, 512, %s1009_s17, %s385_s8, %s825_s28, %s826_s21, %s827_s26  }
 0x1e8 PF: > { %s1092_s27 = sld [smem:[#allocation13_spill]] }
 0x1e9   : > { %s1093_s30 = sld [smem:[#allocation11_spill]] }
 0x1ea   : > { %s1094_s3 = sld [smem:[#allocation14_spill]] }
 0x1ee   : > { %p571_p7 = scmp.ge.s32.totalorder %s1092_s27, 2 }
 0x1ef   : > { %s414_s7 = sand.u32 1, %s1093_s30  }
 0x1f0   : > { %p1095_p8 = scmp.ne.s32.totalorder %s1094_s3, 0  ;;  %s415_s12 = scalar_lea.sflag [#allocation4], %s414_s7 }
 0x1f2   : > { %p565_p9 = pnand %p571_p7, %p1095_p8 }
 0x1f4   : > { %p566_p12 = pneg %p565_p9 }
 0x1f6   : > { %774 = dma.done.wait (%p566_p12), %s415_s12, 512  }
 0x1f7   : > { %776 = vsyncadd (%p566_p12), %s415_s12, 4294966784  ;;  %s19_s16 = sadd.s32 1, %s1092_s27   ;;  %s1096_s12 = sld [smem:[#allocation12_spill]] }
 0x1f8   : > { %p16_p13 = scmp.ge.s32.totalorder %s19_s16, 6   ;;  %s1097_s23 = sld [smem:[#allocation15_spill]] }
 0x1f9   : > { %s1098_s9 = smov %s783_s10  ;;  %s1099_s10 = smov %s787_s11 }
 0x1fa   : > { %s1100_s11 = smov %s953_s14  ;;  %s1101_s13 = smov %s803_s15 }
 0x1fb   : > { %s1103_s15 = smov %s1109_s5  ;;  %18 = sbr.rel (!%p16_p13) target bundleno = 10 (0xa), region = 77 }
 0x1fe   : > { %s1102_s14 = smov %s1097_s23 }
 0x200   :  { %420 = vsyncpa [#allocation3], 1 }
 0x201   :  { %422 = vsyncpa [#allocation3 + $0x1], 1 }
 0x202   :  { %423 = vsyncpa [#allocation6], 1 }
 0x203   :  { %424 = vsyncpa [#allocation4], 1 }
 0x204   :  { %426 = vsyncpa [#allocation4 + $0x1], 1 }

</bundles_post_ra>
